<compile_context>
chip_gen: v6e
topology: v6e:2x2x1
jax: 0.10.0
libtpu: 0.0.40
codegen_flags: <defaults>
</compile_context>

<pallas_src>
import functools

import jax
import jax.numpy as jnp
from jax.experimental import pallas as pl
from jax.experimental.pallas import tpu as pltpu

ALPHA = 0.5  # module default


def _gated_hybrid_kernel(x_ref, o_ref, *, alpha):
    x = x_ref[...].astype(jnp.float32)                        # (T, V)

    # ---- per-row stats / blend weight -------------------------------------
    row_max = jnp.max(x, axis=-1, keepdims=True)               # (T, 1)
    # gate = sigmoid(max(x));  combined = w*relu_probs + (1-w)*soft_probs,
    # with w = alpha*gate (algebraically identical to the reference blend).
    w = alpha * jax.nn.sigmoid(row_max)                        # (T, 1)
    one_minus_w = 1.0 - w                                      # (T, 1)

    # ---- bounded / tanh branch ---------------------------------------------
    # scale = log1p(relu(x)); bounded = tanh(x / (1 + scale))
    inv_scale = pl.reciprocal(1.0 + jnp.log1p(jnp.maximum(x, 0.0)), approx=True)
    relu_probs = (jnp.tanh(x * inv_scale) + 1.0) * 0.5         # (T, V)
    s_relu = jnp.sum(relu_probs, axis=-1, keepdims=True)       # (T, 1)

    # ---- softmax branch (unnormalized exponentials) ------------------------
    e = jnp.exp(x - row_max)                                   # (T, V)
    s_e = jnp.sum(e, axis=-1, keepdims=True)                   # (T, 1)
    inv_se = pl.reciprocal(s_e, approx=True)                   # (T, 1)

    # denom = sum(combined) + 1e-10, computed from per-row scalars only.
    denom = w * s_relu + one_minus_w * (s_e * inv_se) + 1e-10  # (T, 1)
    inv_denom = pl.reciprocal(denom, approx=True)              # (T, 1)

    coef_relu = w * inv_denom                                  # (T, 1)
    coef_soft = one_minus_w * inv_se * inv_denom               # (T, 1)

    # out = (w*relu_probs + (1-w)*e/sum(e)) / denom  — two broadcast muls + add
    o_ref[...] = (coef_relu * relu_probs + coef_soft * e).astype(o_ref.dtype)


def _choose_tile_rows(rows: int, vocab: int, in_itemsize: int,
                      vmem_limit_bytes: int) -> int:
    """Largest sublane-aligned row tile that fits the VMEM budget."""
    # Per-row live bytes: 2x input dbuf + 2x output dbuf (input dtype)
    # + ~3 full-width f32 temporaries (x, relu_probs, e).
    per_row = vocab * (4 * in_itemsize + 3 * 4)
    budget = (vmem_limit_bytes * 3) // 4                 # ~25% headroom
    t = max(8, min(1024, budget // max(per_row, 1)))
    t = (t // 8) * 8

    if rows > 8:
        # keep at least 2 grid steps so both v7x TensorCores get work
        half_rows = -(-rows // 2)
        half_rows = -(-half_rows // 8) * 8
        t = min(t, half_rows)
    else:
        t = 8

    # never make a single block (much) larger than the sublane-padded row count
    padded_rows = -(-rows // 8) * 8
    t = min(t, padded_rows)
    return max(8, t)


def gated_hybrid_activation2(x: jax.Array, alpha: float = ALPHA,
                             tile_rows: int | None = None,
                             vmem_limit_bytes: int = 48 * 1024 * 1024) -> jax.Array:
    """x: (..., vocab) -> same shape/dtype, row-normalized probabilities."""
    orig_shape = x.shape
    v = orig_shape[-1]
    rows = 1
    for d in orig_shape[:-1]:
        rows *= d
    x2 = x.reshape(rows, v)                              # free (contiguous collapse)

    if tile_rows is None:
        tile_rows = _choose_tile_rows(rows, v, jnp.dtype(x.dtype).itemsize,
                                      vmem_limit_bytes)

    kernel = functools.partial(_gated_hybrid_kernel, alpha=float(alpha))
    out = pl.pallas_call(
        kernel,
        out_shape=jax.ShapeDtypeStruct((rows, v), x.dtype),
        grid_spec=pltpu.PrefetchScalarGridSpec(
            num_scalar_prefetch=0,
            grid=(pl.cdiv(rows, tile_rows),),            # ragged last block is masked
            in_specs=[pl.BlockSpec((tile_rows, v), lambda i: (i, 0))],
            out_specs=pl.BlockSpec((tile_rows, v), lambda i: (i, 0)),
        ),
        compiler_params=pltpu.CompilerParams(
            dimension_semantics=("parallel",),
            vmem_limit_bytes=vmem_limit_bytes),
    )(x2)

    return out.reshape(orig_shape)


def _reference(x, alpha=ALPHA):
    soft = jax.nn.softmax(x, axis=-1)
    gate = jax.nn.sigmoid(jnp.max(x, axis=-1, keepdims=True))
    scale = jnp.log1p(jax.nn.relu(x))
    bounded = jnp.tanh(x / (1.0 + scale))
    relu_probs = (bounded + 1.0) / 2.0
    combined = gate * (alpha * relu_probs + (1.0 - alpha) * soft) + (1.0 - gate) * soft
    return combined / (jnp.sum(combined, axis=-1, keepdims=True) + 1e-10)


# TODO(synk): OutputActivation.loss (cross-entropy over the returned probs) is not
# implemented as a Pallas kernel; only the forward pass is translated here.

if __name__ == "__main__":
    key = jax.random.PRNGKey(0)
    batch, seq, vocab = 2, 8, 128
    x = jax.random.normal(key, (batch, seq, vocab), dtype=jnp.float32)

    out = gated_hybrid_activation2(x)
    out = jax.block_until_ready(out)

    ref = _reference(x)
    assert out.shape == (batch, seq, vocab)
    # approx=True reciprocals introduce ~1e-3-level relative deviation vs the
    # exact softmax reference; tolerances are set accordingly.
    assert jnp.allclose(out, ref, atol=1e-4, rtol=1e-2), "mismatch vs reference"
    # each row should still sum to ~1
    assert jnp.allclose(jnp.sum(out, axis=-1), 1.0, atol=5e-3)
    assert bool(jnp.all(jnp.isfinite(out)))

    print("KERNEL_OK")
</pallas_src>

<mosaic_0001>
module attributes {stable_mosaic.version = 11 : i64} {
  func.func @_gated_hybrid_kernel(%arg0: i32, %arg1: memref<8x128xf32, #tpu.memory_space<vmem>>, %arg2: memref<8x128xf32, #tpu.memory_space<vmem>>) attributes {dimension_semantics = [#tpu.dimension_semantics<parallel>], iteration_bounds = array<i64: 2>, scalar_prefetch = 0 : i64, scratch_operands = 0 : i64, tpu.core_type = #tpu.core_type<tc>, window_params = [{transform_indices = @transform_0, window_bounds = array<i64: 8, 128>}, {transform_indices = @transform_1, window_bounds = array<i64: 8, 128>}]} {
    %c0 = arith.constant 0 : index
    %c0_0 = arith.constant 0 : index
    %0 = vector.load %arg1[%c0, %c0_0] : memref<8x128xf32, #tpu.memory_space<vmem>>, vector<8x128xf32>
    %cst = arith.constant dense<0xFF800000> : vector<8xf32>
    %1 = vector.multi_reduction <maximumf>, %0, %cst [1] : vector<8x128xf32> to vector<8xf32>
    %2 = vector.shape_cast %1 : vector<8xf32> to vector<8x1xf32>
    %3 = arith.negf %2 : vector<8x1xf32>
    %4 = math.exp %3 : vector<8x1xf32>
    %cst_1 = arith.constant 1.000000e+00 : f32
    %5 = vector.broadcast %cst_1 : f32 to vector<8x1xf32>
    %6 = arith.addf %5, %4 : vector<8x1xf32>
    %7 = arith.divf %5, %6 : vector<8x1xf32>
    %cst_2 = arith.constant 5.000000e-01 : f32
    %8 = vector.broadcast %cst_2 : f32 to vector<8x1xf32>
    %9 = arith.mulf %8, %7 : vector<8x1xf32>
    %cst_3 = arith.constant 1.000000e+00 : f32
    %10 = vector.broadcast %cst_3 : f32 to vector<8x1xf32>
    %11 = arith.subf %10, %9 : vector<8x1xf32>
    %cst_4 = arith.constant 0.000000e+00 : f32
    %12 = vector.broadcast %cst_4 : f32 to vector<8x128xf32>
    %13 = arith.maximumf %0, %12 : vector<8x128xf32>
    %14 = math.log1p %13 : vector<8x128xf32>
    %cst_5 = arith.constant 1.000000e+00 : f32
    %15 = vector.broadcast %cst_5 : f32 to vector<8x128xf32>
    %16 = arith.addf %15, %14 : vector<8x128xf32>
    %17 = tpu.reciprocal %16 {approx = true} : vector<8x128xf32> -> vector<8x128xf32>
    %18 = arith.mulf %0, %17 : vector<8x128xf32>
    %19 = math.tanh %18 : vector<8x128xf32>
    %cst_6 = arith.constant 1.000000e+00 : f32
    %20 = vector.broadcast %cst_6 : f32 to vector<8x128xf32>
    %21 = arith.addf %19, %20 : vector<8x128xf32>
    %cst_7 = arith.constant 5.000000e-01 : f32
    %22 = vector.broadcast %cst_7 : f32 to vector<8x128xf32>
    %23 = arith.mulf %21, %22 : vector<8x128xf32>
    %cst_8 = arith.constant dense<0.000000e+00> : vector<8xf32>
    %24 = vector.multi_reduction <add>, %23, %cst_8 [1] : vector<8x128xf32> to vector<8xf32>
    %25 = vector.shape_cast %24 : vector<8xf32> to vector<8x1xf32>
    %26 = vector.broadcast %2 : vector<8x1xf32> to vector<8x128xf32>
    %27 = arith.subf %0, %26 : vector<8x128xf32>
    %28 = math.exp %27 : vector<8x128xf32>
    %cst_9 = arith.constant dense<0.000000e+00> : vector<8xf32>
    %29 = vector.multi_reduction <add>, %28, %cst_9 [1] : vector<8x128xf32> to vector<8xf32>
    %30 = vector.shape_cast %29 : vector<8xf32> to vector<8x1xf32>
    %31 = tpu.reciprocal %30 {approx = true} : vector<8x1xf32> -> vector<8x1xf32>
    %32 = arith.mulf %9, %25 : vector<8x1xf32>
    %33 = arith.mulf %30, %31 : vector<8x1xf32>
    %34 = arith.mulf %11, %33 : vector<8x1xf32>
    %35 = arith.addf %32, %34 : vector<8x1xf32>
    %cst_10 = arith.constant 1.000000e-10 : f32
    %36 = vector.broadcast %cst_10 : f32 to vector<8x1xf32>
    %37 = arith.addf %35, %36 : vector<8x1xf32>
    %38 = tpu.reciprocal %37 {approx = true} : vector<8x1xf32> -> vector<8x1xf32>
    %39 = arith.mulf %9, %38 : vector<8x1xf32>
    %40 = arith.mulf %11, %31 : vector<8x1xf32>
    %41 = arith.mulf %40, %38 : vector<8x1xf32>
    %42 = vector.broadcast %39 : vector<8x1xf32> to vector<8x128xf32>
    %43 = arith.mulf %42, %23 : vector<8x128xf32>
    %44 = vector.broadcast %41 : vector<8x1xf32> to vector<8x128xf32>
    %45 = arith.mulf %44, %28 : vector<8x128xf32>
    %46 = arith.addf %43, %45 : vector<8x128xf32>
    %c0_11 = arith.constant 0 : index
    %c0_12 = arith.constant 0 : index
    %47 = vector.load %arg2[%c0_11, %c0_12] : memref<8x128xf32, #tpu.memory_space<vmem>>, vector<8x128xf32>
    tpu.vector_store %arg2[%c0_11, %c0_12], %46 {strides = array<i32>} : memref<8x128xf32, #tpu.memory_space<vmem>>, vector<8x128xf32>,
    return
  }
  func.func @transform_0(%arg0: i32) -> (i32, i32) {
    %c0_i32 = arith.constant 0 : i32
    %c0_i32_0 = arith.constant 0 : i32
    return %arg0, %c0_i32 : i32, i32
  }
  func.func @transform_1(%arg0: i32) -> (i32, i32) {
    %c0_i32 = arith.constant 0 : i32
    %c0_i32_0 = arith.constant 0 : i32
    return %arg0, %c0_i32 : i32, i32
  }
}

</mosaic_0001>

<bundles_post_ra>
// kernel: tpu_custom_call.1
= control target key start
LH: loop header
LB: loop body
LE: loop exit
PB: predicated region body
PF: predicated region fallthrough
CT: control target
= control target key end

     0   :  { %6 = vsyncpa [#allocation3], 0  ;;  %s590_s0 = inlined_call_operand.hbm [shape: f32[16,128], index: 0, kind: input, shape index: {}]   ;;  %s591_s1 = inlined_call_operand.hbm [shape: f32[16,128], index: 1, kind: output, shape index: {}]  }
   0x1   :  { %8 = vsyncpa [#allocation3 + $0x1], 0 }
   0x2   :  { %9 = vsyncpa [#allocation4], 0 }
   0x3   :  { %11 = vsyncpa [#allocation4 + $0x1], 0  ;;  %s445_s6 = smov 0   ;;  %s447_s7 = smov 0  }
   0x4   :  { %s449_s8 = smov 0   ;;  %s451_s9 = smov 0  }
   0x5 LB: > { %s466_s10 = sadd.s32 4294967295, %s431_s9   ;;  %s264_s11 = sadd.s32 4294967294, %s431_s9   ;;  %s431_s9 = sphi %s451_s9, %s608_s9   ;;  %s427_s8 = sphi %s449_s8, %s607_s8   ;;  %s423_s7 = sphi %s447_s7, %s606_s7   ;;  %s419_s6 = sphi %s445_s6, %s605_s6  }
   0x6   : > { %s470_s12 = sadd.s32 1, %s431_s9   ;;  %s24_s13 = sadd.s32 1, %s427_s8 }
   0x7   : > { %s21_s14 = ssub.s32 %s431_s9, %s470_s12  ;;  %p31_p0 = scmp.ne.s32.totalorder %s427_s8, %s423_s7 }
   0x8   : > { %p22_p1 = scmp.eq.s32.totalorder %s21_s14, 0  ;;  %p32_p2 = scmp.eq.s32.totalorder %s431_s9, 0 }
   0x9   : > { %p37_p3 = scmp.ne.s32.totalorder %s423_s7, %s419_s6  ;;  %p38_p4 = scmp.eq.s32.totalorder %s466_s10, 0 }
   0xa   : > { %s482_s15 = scalar_select %p22_p1, %s427_s8, %s24_s13  }
   0xb   : > { %p484_p5 = por %p32_p2, %p31_p0  ;;  %p488_p6 = por %p38_p4, %p37_p3 }
   0xc   : > { %p61_p7 = scmp.eq.s32.totalorder %s466_s10, 1  ;;  %p67_p8 = scmp.eq.s32.totalorder %s264_s11, 1 }
   0xd   : > { %s595_s17 = scalar_select %p488_p6, 1, 0 }
   0xe   : > { %p289_p10 = scmp.lt.s32.totalorder %s431_s9, 2  ;;  %p495_p11 = por %p61_p7, %p31_p0 }
   0xf   : > { %p499_p12 = por %p67_p8, %p37_p3  ;;  %s87_s20 = sand.u32 1, %s427_s8  }
  0x10   : > { %s596_s18 = scalar_select %p495_p11, 1, 0 }
  0x11   : > { %s597_s19 = scalar_select %p499_p12, 1, 0 }
  0x12   : > { %s268_s21 = sshll.u32 %s431_s9, 7  ;;  %s267_s22 = sshll.u32 %s87_s20, 3 }
  0x13   : > { %s508_s25 = scalar_lea.hbm %s590_s0, %s268_s21  ;;  %s91_s26 = scalar_lea.vmem [#allocation2], %s267_s22 }
  0x14   : > { %s98_s27 = sshll.u32 %s91_s26, 4  ;;  %p512_p13 = pnand %p289_p10, %p484_p5  ;;  %s516_s27 = int_to_ptr.vmem [resolvable:$true] %s98_s27 }
  0x15   : > { %s88_s29 = scalar_lea.sflag [#allocation3], %s87_s20  ;;  %s339_s30 = scalar_lea.hbm %s508_s25, 128 }
  0x16   : > { %p340_p2 = scmp.ne.s32.totalorder %s508_s25, %s339_s30  ;;  %p341_p3 = pneg %p512_p13 }
  0x17   : > { %s344_s4 = scalar_lea.hbm %s590_s0, 256  ;;  %p345_p5 = scmp.lt.s32.totalorder %s508_s25, %s590_s0 }
  0x18   : > { %p342_p4 = pnand %p341_p3, %p340_p2  ;;  %p346_p8 = scmp.lt.s32.totalorder %s344_s4, %s339_s30 }
  0x1a   : > { %p343_p7 = pneg %p342_p4  ;;  %p347_p10 = por %p346_p8, %p345_p5 }
  0x1c   : > { %p348_p9 = pnand %p347_p10, %p343_p7 }
  0x1e   : > { %351 = shalt.err (!%p348_p9)
}
  0x1f   : > { %s352_s13 = scalar_lea.vmem %s516_s27, 128  ;;  %s433_s14 = smov [#allocation2]  }
  0x20   : > { %p353_p0 = scmp.ne.s32.totalorder %s516_s27, %s352_s13  ;;  %s357_s16 = sshll.u32 %s433_s14, 4  ;;  %s358_s16 = int_to_ptr.vmem [resolvable:$false] %s357_s16 }
  0x21   : > { %s359_s20 = scalar_lea.vmem %s358_s16, 256  ;;  %p360_p4 = scmp.lt.s32.totalorder %s516_s27, %s358_s16 }
  0x22   : > { %p355_p1 = pnand %p353_p0, %p341_p3  ;;  %p361_p12 = scmp.lt.s32.totalorder %s359_s20, %s352_s13 }
  0x24   : > { %p356_p2 = pneg %p355_p1  ;;  %p362_p11 = por %p361_p12, %p360_p4 }
  0x26   : > { %p363_p6 = pnand %p362_p11, %p356_p2 }
  0x28   : > { %366 = shalt.err (!%p363_p6)
}
  0x29   : > { %284 = dma.hbm_to_vmem [thread:$0]  (!%p512_p13), %s508_s25, 128, %s516_s27, %s88_s29  }
  0x2a   : > { %p599_p9 = scmp.lt.s32.totalorder %s431_s9, 3  ;;  %p600_p7 = scmp.ge.s32.totalorder %s431_s9, 1 }
  0x2c   : > { %p104_p0 = pnand %p600_p7, %p599_p9 }
  0x2d   : > { %s543_s21 = sand.u32 (!%p104_p0), 1, %s423_s7   ;;  %p601_p6 = scmp.ne.s32.totalorder (!%p104_p0), %s595_s17, 0 }
  0x2e   : > { %107 = sbr.rel (%p104_p0) target bundleno = 402 (0x192), region = 24  ;;  %s270_s22 = sshll.u32 (!%p104_p0), %s543_s21, 3 }
  0x2f   : > { %s110_s23 = scalar_lea.sflag (!%p104_p0), [#allocation3], %s543_s21  ;;  %s113_s24 = scalar_lea.vmem (!%p104_p0), [#allocation2], %s270_s22 }
  0x33   : > { %410 = dma.done.wait (%p601_p6), %s110_s23, 128  }
  0x34   : > { %412 = vsyncadd (%p601_p6), %s110_s23, 4294967168  ;;  %v132_v0 = vld [vmem:[%s113_s24] sm:$0xff]  ;;  %s274_s17 = sshll.u32 %s466_s10, 7  ;;  %s131_s25 = scalar_lea.vmem [#allocation5], %s270_s22 }
  0x35   : > { %133 = vmax.xlane.f32.xlu0 %v132_v0  ;;  %v143_v1 = vmax.f32 %v132_v0, 0.0  ;;  %s194_s26 = sshll.u32 %s131_s25, 4  ;;  %s192_s29 = scalar_lea.hbm %s591_s1, %s274_s17  ;;  %s195_s26 = int_to_ptr.vmem [resolvable:$true] %s194_s26 }
  0x36   : > { %s181_s30 = scalar_lea.sflag [#allocation4], %s543_s21  ;;  %s367_s2 = scalar_lea.vmem %s195_s26, 128 }
  0x37   : > { %v144_v2 = vadd.f32 1.0, %v143_v1  ;;  %v147_v3 = vmul.f32 -0.5, %v143_v1  ;;  %v150_v5 = vand.u32 2147483647, %v143_v1  ;;  %p368_p11 = scmp.ne.s32.totalorder %s195_s26, %s367_s2  ;;  %p602_p12 = scmp.ne.s32.totalorder %s596_s18, 0 }
  0x38   : > { %s434_s3 = smov [#allocation5]  }
  0x39   : > { %323 = vlog2.f32 %v144_v2  ;;  %v148_v4 = vadd.f32 1.0, %v147_v3  ;;  %vm151_vm0 = vcmp.lt.f32.partialorder %v150_v5, 0.0004427343  ;;  %p369_p13 = pnand %p368_p11, %p602_p12  ;;  %s371_s10 = sshll.u32 %s434_s3, 4  ;;  %s372_s10 = int_to_ptr.vmem [resolvable:$false] %s371_s10 }
  0x3a   : > { %s373_s4 = scalar_lea.vmem %s372_s10, 256  ;;  %p374_p3 = scmp.lt.s32.totalorder %s195_s26, %s372_s10 }
  0x3b   : > { %v149_v6 = vmul.f32 %v148_v4, %v143_v1  ;;  %p370_p1 = pneg %p369_p13  ;;  %p375_p5 = scmp.lt.s32.totalorder %s373_s4, %s367_s2 }
  0x3d   : > { %p376_p8 = por %p375_p5, %p374_p3 }
  0x3f   : > { %p377_p10 = pnand %p376_p8, %p370_p1 }
  0x46   : > { %v324_v7 = vpop.eup %323 }
  0x47   : > { %v146_v8 = vmul.f32 0.6931472, %v324_v7 }
  0x49   : > { %v152_v9 = vsel %vm151_vm0, %v149_v6, %v146_v8 }
  0x4a   : > { %v153_v10 = vadd.f32 1.0, %v152_v9 }
  0x4c   : > { %325 = vrcp.f32 %v153_v10 }
  0x59   : > { %v326_v11 = vpop.eup %325 }
  0x5a   : > { %v155_v12 = vmul.f32 %v326_v11, %v132_v0 }
  0x5c   : > { %327 = vtanh.f32 %v155_v12 }
  0x69   : > { %v328_v13 = vpop.eup %327 }
  0x6a   : > { %v157_v14 = vadd.f32 1.0, %v328_v13 }
  0x6c   : > { %v158_v15 = vmul.f32 0.5, %v157_v14 }
  0x6e   : > { %159 = vadd.xlane.f32.xlu1 %v158_v15 }
  0xbe   : > { %v134_v16 = vpop.xlane.xlu0 %133 }
  0xbf   : > { %v161_v17 = vsub.f32 %v132_v0, %v134_v16  ;;  %v272_v20 = vmul.f32 -1.442695, %v134_v16 }
  0xc1   : > { %v162_v18 = vmul.f32 1.442695, %v161_v17 }
  0xc3   : > { %329 = vpow2.f32 %v162_v18 }
  0xc4   : > { %331 = vpow2.f32 %v272_v20 }
  0xd0   : > { %v330_v19 = vpop.eup %329 }
  0xd1   : > { %164 = vadd.xlane.f32.xlu0 %v330_v19  ;;  %v332_v21 = vpop.eup %331 }
  0xd2   : > { %v138_v22 = vadd.f32 1.0, %v332_v21 }
  0xd4   : > { %333 = vrcp.f32 %v138_v22 }
  0xe1   : > { %v334_v24 = vpop.eup %333 }
  0xe2   : > { %v141_v25 = vmul.f32 0.5, %v334_v24 }
  0xe4   : > { %v142_v28 = vsub.f32 1.0, %v141_v25 }
  0xf7   : > { %v160_v27 = vpop.xlane.xlu1 %159 }
  0xf8   : > { %v167_v30 = vmul.f32 %v160_v27, %v141_v25 }
 0x15a   : > { %v165_v23 = vpop.xlane.xlu0 %164 }
 0x15b   : > { %335 = vrcp.f32 %v165_v23 }
 0x168   : > { %v336_v26 = vpop.eup %335 }
 0x169   : > { %v168_v29 = vmul.f32 %v336_v26, %v165_v23  ;;  %v174_v34 = vmul.f32 %v336_v26, %v142_v28 }
 0x16b   : > { %v169_v31 = vmul.f32 %v168_v29, %v142_v28 }
 0x16d   : > { %v170_v32 = vadd.f32 %v169_v31, %v167_v30 }
 0x16f   : > { %v171_v33 = vadd.f32 1e-10, %v170_v32 }
 0x171   : > { %337 = vrcp.f32 %v171_v33 }
 0x17e   : > { %v338_v35 = vpop.eup %337 }
 0x17f   : > { %v175_v36 = vmul.f32 %v338_v35, %v174_v34  ;;  %v173_v37 = vmul.f32 %v338_v35, %v141_v25 }
 0x181   : > { %v177_v38 = vmul.f32 %v330_v19, %v175_v36  ;;  %v176_v39 = vmul.f32 %v173_v37, %v158_v15 }
 0x183   : > { %v178_v40 = vadd.f32 %v177_v38, %v176_v39 }
 0x185   : > { %179 = vst [vmem:[%s131_s25] sm:$0xff] %v178_v40 }
 0x186   : > { %380 = shalt.err (!%p377_p10)
}
 0x187   : > { %s381_s5 = scalar_lea.hbm %s192_s29, 128  ;;  %s385_s14 = scalar_lea.hbm %s591_s1, 256 }
 0x188   : > { %p382_p2 = scmp.ne.s32.totalorder %s192_s29, %s381_s5  ;;  %p386_p7 = scmp.lt.s32.totalorder %s192_s29, %s591_s1 }
 0x189   : > { %p387_p0 = scmp.lt.s32.totalorder %s385_s14, %s381_s5 }
 0x18a   : > { %p383_p4 = pnand %p382_p2, %p602_p12 }
 0x18b   : > { %p388_p6 = por %p387_p0, %p386_p7 }
 0x18c   : > { %p384_p9 = pneg %p383_p4 }
 0x18e   : > { %p389_p11 = pnand %p388_p6, %p384_p9 }
 0x190   : > { %392 = shalt.err (!%p389_p11)
}
 0x191   : > { %279 = dma.vmem_to_hbm [thread:$0]  (%p602_p12), %s195_s26, 128, %s192_s29, %s181_s30  }
 0x192 PF: > { %s206_s21 = sand.u32 1, %s419_s6   ;;  %p603_p13 = scmp.ne.s32.totalorder %s597_s19, 0 }
 0x193   : > { %p604_p1 = scmp.ge.s32.totalorder %s431_s9, 2  ;;  %s207_s22 = scalar_lea.sflag [#allocation4], %s206_s21 }
 0x195   : > { %p286_p3 = pnand %p604_p1, %p603_p13 }
 0x197   : > { %p287_p5 = pneg %p286_p3 }
 0x199   : > { %414 = dma.done.wait (%p287_p5), %s207_s22, 128  }
 0x19a   : > { %416 = vsyncadd (%p287_p5), %s207_s22, 4294967168  ;;  %p14_p8 = scmp.ge.s32.totalorder %s470_s12, 4   ;;  %s605_s6 = smov %s423_s7 }
 0x19b   : > { %s606_s7 = smov %s427_s8  ;;  %s607_s8 = smov %s482_s15 }
 0x19c   : > { %s608_s9 = smov %s470_s12  ;;  %16 = sbr.rel (!%p14_p8) target bundleno = 5 (0x5), region = 69 }
 0x1a1   :  { %212 = vsyncpa [#allocation3], 1 }
 0x1a2   :  { %214 = vsyncpa [#allocation3 + $0x1], 1 }
 0x1a3   :  { %215 = vsyncpa [#allocation4], 1 }
 0x1a4   :  { %217 = vsyncpa [#allocation4 + $0x1], 1 }

</bundles_post_ra>
